<compile_context>
chip_gen: v6e
topology: v6e:2x2x1
jax: 0.10.0
libtpu: 0.0.40
codegen_flags: <defaults>
</compile_context>

<pallas_src>
import functools

import jax
import jax.numpy as jnp
from jax.experimental import pallas as pl
from jax.experimental.pallas import tpu as pltpu


# ---------------------------------------------------------------------------
# Optional single-buffering for grid-invariant weight / bias operands.
# Probed once: if this jax/Mosaic build rejects pipeline_mode=pl.Buffered(1),
# fall back to the default (double-buffered) BlockSpec.
# ---------------------------------------------------------------------------
@functools.lru_cache(maxsize=1)
def _weight_pipeline_mode():
    if not hasattr(pl, "Buffered"):
        return None
    try:
        def _probe_kernel(x_ref, o_ref):
            o_ref[...] = x_ref[...] + 1.0

        spec = pl.BlockSpec((8, 128), lambda i: (0, 0),
                            pipeline_mode=pl.Buffered(1))
        out = pl.pallas_call(
            _probe_kernel,
            out_shape=jax.ShapeDtypeStruct((8, 128), jnp.float32),
            grid=(2,),
            in_specs=[spec],
            out_specs=pl.BlockSpec((8, 128), lambda i: (0, 0)),
        )(jnp.zeros((8, 128), jnp.float32))
        jax.block_until_ready(out)
        return pl.Buffered(1)
    except Exception:
        return None


def _resident_spec(block_shape, index_map):
    """BlockSpec for a grid-invariant operand; single-buffered when supported."""
    mode = _weight_pipeline_mode()
    if mode is None:
        return pl.BlockSpec(block_shape, index_map)
    return pl.BlockSpec(block_shape, index_map, pipeline_mode=mode)


# ---------------------------------------------------------------------------
# VMEM budgeting / T-tile selection (per-generation when the info is available)
# ---------------------------------------------------------------------------
def _tpu_vmem_capacity_bytes():
    try:
        return int(pltpu.get_tpu_info().vmem_capacity_bytes)
    except Exception:
        return 64 * 1024 * 1024        # conservative: v7x per-TC VMEM


def _choose_t_tile(T, S, E, H, act_itemsize, attn_itemsize, budget):
    """Largest T tile whose per-step working set fits `budget` bytes."""
    fixed = (2 * S * E * act_itemsize          # v_src block (double buffered)
             + 2 * E * E * act_itemsize        # w_in + w_out (single buffered)
             + 4 * E * act_itemsize            # biases (counted generously)
             + S * E * act_itemsize)           # hv VMEM scratch
    per_row = (2 * H * S * attn_itemsize       # attn tile rows (double buffered)
               + 2 * E * act_itemsize          # output tile rows (double buffered)
               + E * 4)                        # f32 h_attn scratch rows
    avail = budget - fixed
    tT = max(avail // per_row, 8)
    tT = int(tT) // 8 * 8                      # (8,128) sublane alignment
    return T if tT >= T else tT


# ---------------------------------------------------------------------------
# Fused kernel: one (batch, T-tile) per grid step
# ---------------------------------------------------------------------------
def _mha_v_fused_kernel(v_src_ref, attn_ref, w_in_ref, b_in_ref,
                        w_out_ref, b_out_ref, o_ref,
                        hv_ref, hattn_ref, *, num_heads, head_dim):
    """Block shapes:
      v_src_ref : (1, S, E)     value-source hidden states (h or h_p) for this batch
      attn_ref  : (1, H, tT, S)
      w_in_ref  : (E, E)        F.linear layout (out_features, in_features)
      b_in_ref  : (1, E)
      w_out_ref : (E, E)
      b_out_ref : (1, E)
      o_ref     : (1, tT, E)    lane-dense output tile
      hv_ref    : (S, E)        VMEM scratch: projected values, cached across T tiles
      hattn_ref : (tT, E) f32   VMEM scratch: per-head results assembled lane-dense
    """
    # ---- V projection: computed once per batch element (first T tile only) ----
    @pl.when(pl.program_id(1) == 0)
    def _():
        x = v_src_ref[0]                                        # (S, E)
        hv = jax.lax.dot_general(                               # x @ W_in^T
            x, w_in_ref[...],
            dimension_numbers=(((1,), (1,)), ((), ())),
            preferred_element_type=jnp.float32)
        hv = hv + b_in_ref[...].astype(jnp.float32)             # bias added once
        hv_ref[...] = hv.astype(hv_ref.dtype)

    # ---- Per-head (tT,S)@(S,Hd), stored lane-dense into the (tT,E) scratch ----
    # Static Python loop with static ref slices: each per-head result goes straight
    # to VMEM scratch (no concat, nothing kept live across head iterations).
    for hh in range(num_heads):
        lo = hh * head_dim
        a_h = attn_ref[0, hh]                                   # (tT, S)
        v_h = hv_ref[:, lo:lo + head_dim]                       # (S, Hd) static slice
        hattn_ref[:, lo:lo + head_dim] = jnp.dot(
            a_h, v_h, preferred_element_type=jnp.float32)

    # ---- Output projection: out = h_attn @ W_out^T + b_out --------------------
    out = jax.lax.dot_general(
        hattn_ref[...].astype(hv_ref.dtype), w_out_ref[...],
        dimension_numbers=(((1,), (1,)), ((), ())),
        preferred_element_type=jnp.float32)
    out = out + b_out_ref[...].astype(jnp.float32)
    o_ref[0] = out.astype(o_ref.dtype)


# ---------------------------------------------------------------------------
# Module forward (self-attention if h_p is None, else encoder-decoder attention)
# ---------------------------------------------------------------------------
def multihead_attention_v_forward(h, attn, w_in, b_in, w_out, b_out,
                                  num_heads, h_p=None):
    """h: (T, B, E), h_p: (S, B, E) or None, attn: (B*num_heads, T, S) -> (T, B, E)."""
    T, B, E = h.shape
    H = num_heads
    Hd = E // H
    assert H * Hd == E, "embed_dim must be divisible by num_heads"
    v_src = h if h_p is None else h_p            # value source (self vs enc-dec mode)
    S = v_src.shape[0]
    assert v_src.shape == (S, B, E)
    assert attn.shape == (B * H, T, S)

    # Batch-major layouts: only leading dims are blocked; the last two block dims are
    # always either 8-aligned or the full array dims (TPU (8,128) tiling friendly).
    # The attn reshape is free (batch-major head flattening matches PyTorch).
    # TODO(synk): if the downstream consumer accepts (B, T, E), drop the output transpose.
    v_src_b = jnp.transpose(v_src, (1, 0, 2))    # (B, S, E)
    attn_b = attn.reshape(B, H, T, S)            # (B, H, T, S)  (dtype untouched)

    act_dtype = h.dtype
    vmem_cap = _tpu_vmem_capacity_bytes()
    # ~28 MiB working-set target on v7x (64 MiB VMEM), ~56 MiB on v5e/v6e (128 MiB).
    vmem_budget = min(vmem_cap // 2 - 4 * 1024 * 1024, 56 * 1024 * 1024)
    vmem_limit = min(vmem_cap, vmem_budget + 32 * 1024 * 1024)

    tT = _choose_t_tile(
        T, S, E, H,
        act_itemsize=jnp.dtype(act_dtype).itemsize,
        attn_itemsize=jnp.dtype(attn.dtype).itemsize,
        budget=vmem_budget)
    nT = pl.cdiv(T, tT)

    kernel = functools.partial(_mha_v_fused_kernel, num_heads=H, head_dim=Hd)

    out_b = pl.pallas_call(
        kernel,
        out_shape=jax.ShapeDtypeStruct((B, T, E), act_dtype),
        grid=(B, nT),
        in_specs=[
            # v_src: block index changes only with b -> re-fetched once per batch elem.
            pl.BlockSpec((1, S, E), lambda b, t: (b, 0, 0)),
            # attn: the dominant HBM stream; default Buffered(2) pipelining.
            # (Deepen to pl.Buffered(3) only if profiling shows its DMA still exposed.)
            pl.BlockSpec((1, H, tT, S), lambda b, t: (b, 0, t, 0)),
            # Weights / biases: VMEM-resident, single-buffered when supported.
            _resident_spec((E, E), lambda b, t: (0, 0)),
            _resident_spec((1, E), lambda b, t: (0, 0)),
            _resident_spec((E, E), lambda b, t: (0, 0)),
            _resident_spec((1, E), lambda b, t: (0, 0)),
        ],
        out_specs=pl.BlockSpec((1, tT, E), lambda b, t: (b, t, 0)),
        scratch_shapes=[
            pltpu.VMEM((S, E), act_dtype),       # hv cache (persists across T tiles)
            pltpu.VMEM((tT, E), jnp.float32),    # lane-dense h_attn assembly
        ],
        compiler_params=pltpu.CompilerParams(
            # B shards across TCs (v7x megacore); the T axis must stay on one core so
            # the cached hv scratch is reused across its tiles -> "arbitrary".
            dimension_semantics=("parallel", "arbitrary"),
            vmem_limit_bytes=vmem_limit,
        ),
    )(v_src_b, attn_b, w_in, b_in.reshape(1, E), w_out, b_out.reshape(1, E))

    return jnp.transpose(out_b, (1, 0, 2))       # (T, B, E)


# ---------------------------------------------------------------------------
# Pure-JAX reference (mirrors the PyTorch forward)
# ---------------------------------------------------------------------------
def reference_forward(h, attn, w_in, b_in, w_out, b_out, num_heads, h_p=None):
    T, B, E = h.shape
    Hd = E // num_heads
    v_src = h if h_p is None else h_p
    S = v_src.shape[0]
    hv = v_src.reshape(S * B, E) @ w_in.T + b_in
    hv = hv.reshape(S, B * num_heads, Hd).transpose(1, 0, 2)    # (B*H, S, Hd)
    ha = jnp.einsum("bts,bsd->btd", attn, hv)                   # (B*H, T, Hd)
    ha = ha.transpose(1, 0, 2).reshape(T, B, E)
    out = ha.reshape(T * B, E) @ w_out.T + b_out
    return out.reshape(T, B, E)


def xavier_uniform(key, shape, dtype=jnp.float32):
    fan_out, fan_in = shape
    bound = (6.0 / (fan_in + fan_out)) ** 0.5
    return jax.random.uniform(key, shape, dtype, minval=-bound, maxval=bound)


if __name__ == "__main__":
    tgt_len, bsz, embed_dim, num_heads = 8, 2, 32, 4
    src_len = tgt_len

    key = jax.random.PRNGKey(0)
    k_h, k_hp, k_attn, k_attn2, k_win, k_wout = jax.random.split(key, 6)

    h = jax.random.normal(k_h, (tgt_len, bsz, embed_dim), jnp.float32)
    attn = jax.nn.softmax(
        jax.random.normal(k_attn, (bsz * num_heads, tgt_len, src_len), jnp.float32),
        axis=-1)

    w_in = xavier_uniform(k_win, (embed_dim, embed_dim))
    b_in = jnp.zeros((embed_dim,), jnp.float32)
    w_out = xavier_uniform(k_wout, (embed_dim, embed_dim))
    b_out = jnp.zeros((embed_dim,), jnp.float32)

    # Resolve (and cache) whether single-buffered weight specs are supported,
    # outside of any jit trace.
    _weight_pipeline_mode()

    fwd = jax.jit(multihead_attention_v_forward, static_argnames=("num_heads",))

    # --- self-attention mode (S == T), f32 ---
    out = jax.block_until_ready(
        fwd(h, attn, w_in, b_in, w_out, b_out, num_heads=num_heads))
    ref = reference_forward(h, attn, w_in, b_in, w_out, b_out, num_heads)
    assert out.shape == (tgt_len, bsz, embed_dim)
    assert jnp.allclose(out, ref, atol=1e-4, rtol=1e-4)

    # --- encoder-decoder attention mode (S != T), f32 ---
    enc_len = 16
    h_p = jax.random.normal(k_hp, (enc_len, bsz, embed_dim), jnp.float32)
    attn_x = jax.nn.softmax(
        jax.random.normal(k_attn2, (bsz * num_heads, tgt_len, enc_len), jnp.float32),
        axis=-1)
    out_x = jax.block_until_ready(
        fwd(h, attn_x, w_in, b_in, w_out, b_out, num_heads=num_heads, h_p=h_p))
    ref_x = reference_forward(h, attn_x, w_in, b_in, w_out, b_out, num_heads, h_p=h_p)
    assert out_x.shape == (tgt_len, bsz, embed_dim)
    assert jnp.allclose(out_x, ref_x, atol=1e-4, rtol=1e-4)

    # --- bf16 activations/weights with f32 MXU accumulation (v6e/v7x fast path) ---
    # Deliberate precision choice: hv / h_attn are rounded to bf16 between matmuls.
    bf = jnp.bfloat16
    out_bf16 = jax.block_until_ready(
        fwd(h.astype(bf), attn.astype(bf), w_in.astype(bf), b_in.astype(bf),
            w_out.astype(bf), b_out.astype(bf), num_heads=num_heads))
    assert out_bf16.dtype == bf
    assert jnp.allclose(out_bf16.astype(jnp.float32), ref, atol=2e-1, rtol=2e-1)

    print("KERNEL_OK")
</pallas_src>

<mosaic_0001>
module attributes {stable_mosaic.version = 11 : i64} {
  func.func @_probe_kernel(%arg0: i32, %arg1: memref<8x128xf32, #tpu.memory_space<vmem>>, %arg2: memref<8x128xf32, #tpu.memory_space<vmem>>) attributes {dimension_semantics = [#tpu.dimension_semantics<arbitrary>], iteration_bounds = array<i64: 2>, scalar_prefetch = 0 : i64, scratch_operands = 0 : i64, tpu.core_type = #tpu.core_type<tc>, window_params = [{pipeline_mode = #tpu.pipeline_mode<synchronous>, transform_indices = @transform_0, window_bounds = array<i64: 8, 128>}, {pipeline_mode = #tpu.pipeline_mode<synchronous>, transform_indices = @transform_1, window_bounds = array<i64: 8, 128>}]} {
    %c0 = arith.constant 0 : index
    %c0_0 = arith.constant 0 : index
    %0 = vector.load %arg1[%c0, %c0_0] : memref<8x128xf32, #tpu.memory_space<vmem>>, vector<8x128xf32>
    %cst = arith.constant 1.000000e+00 : f32
    %1 = vector.broadcast %cst : f32 to vector<8x128xf32>
    %2 = arith.addf %0, %1 : vector<8x128xf32>
    %c0_1 = arith.constant 0 : index
    %c0_2 = arith.constant 0 : index
    %3 = vector.load %arg2[%c0_1, %c0_2] : memref<8x128xf32, #tpu.memory_space<vmem>>, vector<8x128xf32>
    tpu.vector_store %arg2[%c0_1, %c0_2], %2 {strides = array<i32>} : memref<8x128xf32, #tpu.memory_space<vmem>>, vector<8x128xf32>,
    return
  }
  func.func @transform_0(%arg0: i32) -> (i32, i32) {
    %c0_i32 = arith.constant 0 : i32
    %c0_i32_0 = arith.constant 0 : i32
    %c0_i32_1 = arith.constant 0 : i32
    return %c0_i32, %c0_i32_0 : i32, i32
  }
  func.func @transform_1(%arg0: i32) -> (i32, i32) {
    %c0_i32 = arith.constant 0 : i32
    %c0_i32_0 = arith.constant 0 : i32
    %c0_i32_1 = arith.constant 0 : i32
    return %c0_i32, %c0_i32_0 : i32, i32
  }
}

module attributes {stable_mosaic.version = 11 : i64} {
  func.func @_mha_v_fused_kernel(%arg0: i32, %arg1: i32, %arg2: memref<1x8x32xf32, #tpu.memory_space<vmem>>, %arg3: memref<1x4x8x8xf32, #tpu.memory_space<vmem>>, %arg4: memref<32x32xf32, #tpu.memory_space<vmem>>, %arg5: memref<1x32xf32, #tpu.memory_space<vmem>>, %arg6: memref<32x32xf32, #tpu.memory_space<vmem>>, %arg7: memref<1x32xf32, #tpu.memory_space<vmem>>, %arg8: memref<1x8x32xf32, #tpu.memory_space<vmem>>, %arg9: memref<8x32xf32, #tpu.memory_space<vmem>>, %arg10: memref<8x32xf32, #tpu.memory_space<vmem>>) attributes {dimension_semantics = [#tpu.dimension_semantics<parallel>, #tpu.dimension_semantics<arbitrary>], iteration_bounds = array<i64: 2, 1>, scalar_prefetch = 0 : i64, scratch_operands = 2 : i64, tpu.core_type = #tpu.core_type<tc>, window_params = [{transform_indices = @transform_0, window_bounds = array<i64: 1, 8, 32>}, {transform_indices = @transform_1, window_bounds = array<i64: 1, 4, 8, 8>}, {pipeline_mode = #tpu.pipeline_mode<synchronous>, transform_indices = @transform_2, window_bounds = array<i64: 32, 32>}, {pipeline_mode = #tpu.pipeline_mode<synchronous>, transform_indices = @transform_3, window_bounds = array<i64: 1, 32>}, {pipeline_mode = #tpu.pipeline_mode<synchronous>, transform_indices = @transform_4, window_bounds = array<i64: 32, 32>}, {pipeline_mode = #tpu.pipeline_mode<synchronous>, transform_indices = @transform_5, window_bounds = array<i64: 1, 32>}, {transform_indices = @transform_6, window_bounds = array<i64: 1, 8, 32>}]} {
    %c0_i32 = arith.constant 0 : i32
    %0 = arith.cmpi eq, %arg1, %c0_i32 : i32
    %1 = arith.extui %0 : i1 to i32
    %c0_i32_0 = arith.constant 0 : i32
    %2 = arith.cmpi ne, %1, %c0_i32_0 : i32
    scf.if %2 {
      %c0_39 = arith.constant 0 : index
      %c0_40 = arith.constant 0 : index
      %c0_41 = arith.constant 0 : index
      %32 = vector.load %arg2[%c0_39, %c0_40, %c0_41] : memref<1x8x32xf32, #tpu.memory_space<vmem>>, vector<1x8x32xf32>
      %33 = vector.shape_cast %32 : vector<1x8x32xf32> to vector<8x32xf32>
      %c0_42 = arith.constant 0 : index
      %c0_43 = arith.constant 0 : index
      %34 = vector.load %arg4[%c0_42, %c0_43] : memref<32x32xf32, #tpu.memory_space<vmem>>, vector<32x32xf32>
      %cst_44 = arith.constant dense<0.000000e+00> : vector<8x32xf32>
      %35 = tpu.matmul %33, %34, %cst_44 {dimension_numbers = #tpu.dot_dimension_numbers<[1], [1], [0], [0], [0, 0, 1, 0], [], []>} : vector<8x32xf32>, vector<32x32xf32>, vector<8x32xf32> -> vector<8x32xf32>
      %c0_45 = arith.constant 0 : index
      %c0_46 = arith.constant 0 : index
      %36 = vector.load %arg5[%c0_45, %c0_46] : memref<1x32xf32, #tpu.memory_space<vmem>>, vector<1x32xf32>
      %37 = vector.broadcast %36 : vector<1x32xf32> to vector<8x32xf32>
      %38 = arith.addf %35, %37 : vector<8x32xf32>
      %c0_47 = arith.constant 0 : index
      %c0_48 = arith.constant 0 : index
      %39 = vector.load %arg9[%c0_47, %c0_48] : memref<8x32xf32, #tpu.memory_space<vmem>>, vector<8x32xf32>
      tpu.vector_store %arg9[%c0_47, %c0_48], %38 {strides = array<i32>} : memref<8x32xf32, #tpu.memory_space<vmem>>, vector<8x32xf32>,
    } else {
    }
    %c0 = arith.constant 0 : index
    %c0_1 = arith.constant 0 : index
    %c0_2 = arith.constant 0 : index
    %c0_3 = arith.constant 0 : index
    %3 = vector.load %arg3[%c0, %c0_1, %c0_2, %c0_3] : memref<1x4x8x8xf32, #tpu.memory_space<vmem>>, vector<1x1x8x8xf32>
    %4 = vector.shape_cast %3 : vector<1x1x8x8xf32> to vector<8x8xf32>
    %c0_4 = arith.constant 0 : index
    %c0_5 = arith.constant 0 : index
    %5 = vector.load %arg9[%c0_4, %c0_5] : memref<8x32xf32, #tpu.memory_space<vmem>>, vector<8x8xf32>
    %cst = arith.constant dense<0.000000e+00> : vector<8x8xf32>
    %6 = tpu.matmul %4, %5, %cst {dimension_numbers = #tpu.dot_dimension_numbers<[1], [0], [0], [1], [0, 0, 1, 1], [], []>} : vector<8x8xf32>, vector<8x8xf32>, vector<8x8xf32> -> vector<8x8xf32>
    %c0_6 = arith.constant 0 : index
    %c0_7 = arith.constant 0 : index
    %7 = vector.load %arg10[%c0_6, %c0_7] : memref<8x32xf32, #tpu.memory_space<vmem>>, vector<8x8xf32>
    tpu.vector_store %arg10[%c0_6, %c0_7], %6 {strides = array<i32>} : memref<8x32xf32, #tpu.memory_space<vmem>>, vector<8x8xf32>,
    %c0_8 = arith.constant 0 : index
    %c1 = arith.constant 1 : index
    %c0_9 = arith.constant 0 : index
    %c0_10 = arith.constant 0 : index
    %8 = vector.load %arg3[%c0_8, %c1, %c0_9, %c0_10] : memref<1x4x8x8xf32, #tpu.memory_space<vmem>>, vector<1x1x8x8xf32>
    %9 = vector.shape_cast %8 : vector<1x1x8x8xf32> to vector<8x8xf32>
    %c0_11 = arith.constant 0 : index
    %c8 = arith.constant 8 : index
    %10 = vector.load %arg9[%c0_11, %c8] : memref<8x32xf32, #tpu.memory_space<vmem>>, vector<8x8xf32>
    %cst_12 = arith.constant dense<0.000000e+00> : vector<8x8xf32>
    %11 = tpu.matmul %9, %10, %cst_12 {dimension_numbers = #tpu.dot_dimension_numbers<[1], [0], [0], [1], [0, 0, 1, 1], [], []>} : vector<8x8xf32>, vector<8x8xf32>, vector<8x8xf32> -> vector<8x8xf32>
    %c0_13 = arith.constant 0 : index
    %c8_14 = arith.constant 8 : index
    %12 = vector.load %arg10[%c0_13, %c8_14] : memref<8x32xf32, #tpu.memory_space<vmem>>, vector<8x8xf32>
    tpu.vector_store %arg10[%c0_13, %c8_14], %11 {strides = array<i32>} : memref<8x32xf32, #tpu.memory_space<vmem>>, vector<8x8xf32>,
    %c0_15 = arith.constant 0 : index
    %c2 = arith.constant 2 : index
    %c0_16 = arith.constant 0 : index
    %c0_17 = arith.constant 0 : index
    %13 = vector.load %arg3[%c0_15, %c2, %c0_16, %c0_17] : memref<1x4x8x8xf32, #tpu.memory_space<vmem>>, vector<1x1x8x8xf32>
    %14 = vector.shape_cast %13 : vector<1x1x8x8xf32> to vector<8x8xf32>
    %c0_18 = arith.constant 0 : index
    %c16 = arith.constant 16 : index
    %15 = vector.load %arg9[%c0_18, %c16] : memref<8x32xf32, #tpu.memory_space<vmem>>, vector<8x8xf32>
    %cst_19 = arith.constant dense<0.000000e+00> : vector<8x8xf32>
    %16 = tpu.matmul %14, %15, %cst_19 {dimension_numbers = #tpu.dot_dimension_numbers<[1], [0], [0], [1], [0, 0, 1, 1], [], []>} : vector<8x8xf32>, vector<8x8xf32>, vector<8x8xf32> -> vector<8x8xf32>
    %c0_20 = arith.constant 0 : index
    %c16_21 = arith.constant 16 : index
    %17 = vector.load %arg10[%c0_20, %c16_21] : memref<8x32xf32, #tpu.memory_space<vmem>>, vector<8x8xf32>
    tpu.vector_store %arg10[%c0_20, %c16_21], %16 {strides = array<i32>} : memref<8x32xf32, #tpu.memory_space<vmem>>, vector<8x8xf32>,
    %c0_22 = arith.constant 0 : index
    %c3 = arith.constant 3 : index
    %c0_23 = arith.constant 0 : index
    %c0_24 = arith.constant 0 : index
    %18 = vector.load %arg3[%c0_22, %c3, %c0_23, %c0_24] : memref<1x4x8x8xf32, #tpu.memory_space<vmem>>, vector<1x1x8x8xf32>
    %19 = vector.shape_cast %18 : vector<1x1x8x8xf32> to vector<8x8xf32>
    %c0_25 = arith.constant 0 : index
    %c24 = arith.constant 24 : index
    %20 = vector.load %arg9[%c0_25, %c24] : memref<8x32xf32, #tpu.memory_space<vmem>>, vector<8x8xf32>
    %cst_26 = arith.constant dense<0.000000e+00> : vector<8x8xf32>
    %21 = tpu.matmul %19, %20, %cst_26 {dimension_numbers = #tpu.dot_dimension_numbers<[1], [0], [0], [1], [0, 0, 1, 1], [], []>} : vector<8x8xf32>, vector<8x8xf32>, vector<8x8xf32> -> vector<8x8xf32>
    %c0_27 = arith.constant 0 : index
    %c24_28 = arith.constant 24 : index
    %22 = vector.load %arg10[%c0_27, %c24_28] : memref<8x32xf32, #tpu.memory_space<vmem>>, vector<8x8xf32>
    tpu.vector_store %arg10[%c0_27, %c24_28], %21 {strides = array<i32>} : memref<8x32xf32, #tpu.memory_space<vmem>>, vector<8x8xf32>,
    %c0_29 = arith.constant 0 : index
    %c0_30 = arith.constant 0 : index
    %23 = vector.load %arg10[%c0_29, %c0_30] : memref<8x32xf32, #tpu.memory_space<vmem>>, vector<8x32xf32>
    %c0_31 = arith.constant 0 : index
    %c0_32 = arith.constant 0 : index
    %24 = vector.load %arg6[%c0_31, %c0_32] : memref<32x32xf32, #tpu.memory_space<vmem>>, vector<32x32xf32>
    %cst_33 = arith.constant dense<0.000000e+00> : vector<8x32xf32>
    %25 = tpu.matmul %23, %24, %cst_33 {dimension_numbers = #tpu.dot_dimension_numbers<[1], [1], [0], [0], [0, 0, 1, 0], [], []>} : vector<8x32xf32>, vector<32x32xf32>, vector<8x32xf32> -> vector<8x32xf32>
    %c0_34 = arith.constant 0 : index
    %c0_35 = arith.constant 0 : index
    %26 = vector.load %arg7[%c0_34, %c0_35] : memref<1x32xf32, #tpu.memory_space<vmem>>, vector<1x32xf32>
    %27 = vector.broadcast %26 : vector<1x32xf32> to vector<8x32xf32>
    %28 = arith.addf %25, %27 : vector<8x32xf32>
    %c0_36 = arith.constant 0 : index
    %c0_37 = arith.constant 0 : index
    %c0_38 = arith.constant 0 : index
    %29 = vector.load %arg8[%c0_36, %c0_37, %c0_38] : memref<1x8x32xf32, #tpu.memory_space<vmem>>, vector<1x8x32xf32>
    %30 = vector.shape_cast %29 : vector<1x8x32xf32> to vector<8x32xf32>
    %31 = vector.shape_cast %28 : vector<8x32xf32> to vector<1x8x32xf32>
    tpu.vector_store %arg8[%c0_36, %c0_37, %c0_38], %31 {strides = array<i32>} : memref<1x8x32xf32, #tpu.memory_space<vmem>>, vector<1x8x32xf32>,
    return
  }
  func.func @transform_0(%arg0: i32, %arg1: i32) -> (i32, i32, i32) {
    %c0_i32 = arith.constant 0 : i32
    %c0_i32_0 = arith.constant 0 : i32
    %c0_i32_1 = arith.constant 0 : i32
    return %arg0, %c0_i32, %c0_i32_0 : i32, i32, i32
  }
  func.func @transform_1(%arg0: i32, %arg1: i32) -> (i32, i32, i32, i32) {
    %c0_i32 = arith.constant 0 : i32
    %c0_i32_0 = arith.constant 0 : i32
    %c0_i32_1 = arith.constant 0 : i32
    return %arg0, %c0_i32, %arg1, %c0_i32_0 : i32, i32, i32, i32
  }
  func.func @transform_2(%arg0: i32, %arg1: i32) -> (i32, i32) {
    %c0_i32 = arith.constant 0 : i32
    %c0_i32_0 = arith.constant 0 : i32
    %c0_i32_1 = arith.constant 0 : i32
    return %c0_i32, %c0_i32_0 : i32, i32
  }
  func.func @transform_3(%arg0: i32, %arg1: i32) -> (i32, i32) {
    %c0_i32 = arith.constant 0 : i32
    %c0_i32_0 = arith.constant 0 : i32
    %c0_i32_1 = arith.constant 0 : i32
    return %c0_i32, %c0_i32_0 : i32, i32
  }
  func.func @transform_4(%arg0: i32, %arg1: i32) -> (i32, i32) {
    %c0_i32 = arith.constant 0 : i32
    %c0_i32_0 = arith.constant 0 : i32
    %c0_i32_1 = arith.constant 0 : i32
    return %c0_i32, %c0_i32_0 : i32, i32
  }
  func.func @transform_5(%arg0: i32, %arg1: i32) -> (i32, i32) {
    %c0_i32 = arith.constant 0 : i32
    %c0_i32_0 = arith.constant 0 : i32
    %c0_i32_1 = arith.constant 0 : i32
    return %c0_i32, %c0_i32_0 : i32, i32
  }
  func.func @transform_6(%arg0: i32, %arg1: i32) -> (i32, i32, i32) {
    %c0_i32 = arith.constant 0 : i32
    %c0_i32_0 = arith.constant 0 : i32
    return %arg0, %arg1, %c0_i32 : i32, i32, i32
  }
}

</mosaic_0001>

<bundles_post_ra>
// kernel: tpu_custom_call.1
= control target key start
LH: loop header
LB: loop body
LE: loop exit
PB: predicated region body
PF: predicated region fallthrough
CT: control target
= control target key end

     0   :  { %6 = vsyncpa [#allocation3], 0  ;;  %s305_s0 = inlined_call_operand.hbm [shape: f32[8,128], index: 0, kind: input, shape index: {}]   ;;  %s306_s1 = inlined_call_operand.hbm [shape: f32[8,128], index: 1, kind: output, shape index: {}]  }
   0x1   :  { %7 = vsyncpa [#allocation4], 0  ;;  %s258_s6 = smov 0  }
   0x2 LB: > { %s145_s7 = sadd.s32 4294967295, %s244_s6   ;;  %p146_p0 = scmp.ge.s32.totalorder %s244_s6, 1  ;;  %s244_s6 = sphi %s258_s6, %s13_s6  }
   0x3   : > { %p60_p1 = scmp.lt.s32.totalorder %s244_s6, 3  ;;  %p270_p3 = scmp.eq.s32.totalorder %s145_s7, 0 }
   0x4   : > { %s246_s10 = smov [#allocation2]  }
   0x5   : > { %p266_p2 = pnand %p146_p0, %p60_p1  ;;  %s73_s11 = sshll.u32 %s246_s10, 4  ;;  %s74_s11 = int_to_ptr.vmem [resolvable:$true] %s73_s11 }
   0x6   : > { %s191_s12 = scalar_lea.vmem %s74_s11, 128  ;;  %p199_p10 = scmp.lt.s32.totalorder %s74_s11, %s74_s11 }
   0x7   : > { %p162_p4 = pneg %p266_p2  ;;  %p192_p7 = scmp.ne.s32.totalorder %s74_s11, %s191_s12 }
   0x8   : > { %p200_p11 = scmp.lt.s32.totalorder %s191_s12, %s191_s12 }
   0x9   : > { %p163_p5 = pnand %p270_p3, %p162_p4 }
   0xa   : > { %p201_p12 = por %p200_p11, %p199_p10 }
   0xb   : > { %p182_p6 = pneg %p163_p5 }
   0xd   : > { %p194_p8 = pnand %p192_p7, %p182_p6 }
   0xf   : > { %p195_p9 = pneg %p194_p8 }
  0x11   : > { %p202_p13 = pnand %p201_p12, %p195_p9 }
  0x13   : > { %205 = shalt.err (!%p202_p13)
}
  0x14   : > { %165 = dma.hbm_to_vmem [thread:$0]  (!%p163_p5), %s305_s0, 128, %s74_s11, [#allocation3]  }
  0x15   : > { %86 = sbr.rel (%p266_p2) target bundleno = 42 (0x2a), region = 24 }
  0x1a   : > { %235 = dma.done.wait (%p270_p3), [#allocation3], 128  }
  0x1b   : > { %237 = vsyncadd (%p270_p3), [#allocation3], 4294967168  ;;  %s247_s15 = smov [#allocation5]   ;;  %v96_v0 = vld [vmem:[#allocation2] sm:$0xff]  ;;  %p287_p0 = scmp.eq.s32.totalorder %s145_s7, 1 }
  0x1c   : > { %s106_s16 = sshll.u32 %s247_s15, 4  ;;  %v97_v1 = vadd.f32 1.0, %v96_v0  ;;  %s107_s16 = int_to_ptr.vmem [resolvable:$true] %s106_s16 }
  0x1d   : > { %s206_s18 = scalar_lea.vmem %s107_s16, 128  ;;  %p213_p5 = scmp.lt.s32.totalorder %s107_s16, %s107_s16 }
  0x1e   : > { %98 = vst [vmem:[#allocation5] sm:$0xff] %v97_v1  ;;  %p207_p1 = scmp.ne.s32.totalorder %s107_s16, %s206_s18  ;;  %p214_p6 = scmp.lt.s32.totalorder %s206_s18, %s206_s18 }
  0x20   : > { %p208_p2 = pnand %p207_p1, %p287_p0  ;;  %p215_p7 = por %p214_p6, %p213_p5 }
  0x22   : > { %p209_p4 = pneg %p208_p2 }
  0x24   : > { %p216_p3 = pnand %p215_p7, %p209_p4 }
  0x26   : > { %219 = shalt.err (!%p216_p3)
}
  0x27   : > { %159 = dma.vmem_to_hbm [thread:$0]  (%p287_p0), %s107_s16, 128, %s306_s1, [#allocation4]  }
  0x28   : > { %239 = dma.done.wait (%p287_p0), [#allocation4], 128  }
  0x29   : > { %241 = vsyncadd (%p287_p0), [#allocation4], 4294967168 }
  0x2a PF: > { %s13_s6 = sadd.s32 1, %s244_s6  }
  0x2b   : > { %p10_p8 = scmp.ge.s32.totalorder %s13_s6, 4  }
  0x2d   :  { %12 = sbr.rel (!%p10_p8) target bundleno = 2 (0x2), region = 53 }
  0x32   :  { %119 = vsyncpa [#allocation3], 1 }
  0x33   :  { %121 = vsyncpa [#allocation3 + $0x1], 1 }
  0x34   :  { %122 = vsyncpa [#allocation4], 1 }
  0x35   :  { %124 = vsyncpa [#allocation4 + $0x1], 1 }

// kernel: multihead_attention_v_forward.1
= control target key start
LH: loop header
LB: loop body
LE: loop exit
PB: predicated region body
PF: predicated region fallthrough
CT: control target
= control target key end

     0   :  { %11 = vsyncpa [#allocation5], 0  ;;  %s1499_s0 = inlined_call_operand.vmem [shape: f32[2,8,32], index: 0, kind: input, shape index: {}]   ;;  %s1500_s1 = inlined_call_operand.hbm [shape: f32[2,4,8,8], index: 1, kind: input, shape index: {}]   ;;  %s1501_s2 = inlined_call_operand.vmem [shape: f32[32,32], index: 2, kind: input, shape index: {}]   ;;  %s1502_s3 = inlined_call_operand.vmem [shape: f32[1,32], index: 3, kind: input, shape index: {}]   ;;  %s1503_s4 = inlined_call_operand.hbm [shape: f32[32,32], index: 4, kind: input, shape index: {}]   ;;  %s1504_s5 = inlined_call_operand.vmem [shape: f32[1,32], index: 5, kind: input, shape index: {}]   ;;  %s1505_s6 = inlined_call_operand.vmem [shape: f32[2,8,32], index: 6, kind: output, shape index: {}]  }
   0x1   :  { %13 = vsyncpa [#allocation5 + $0x1], 0 }
   0x2   :  { %14 = vsyncpa [#allocation7], 0  ;;  %s1297_s21 = smov 0   ;;  %s1299_s22 = smov 0  }
   0x3   :  { %s1301_s23 = smov 0   ;;  %s1303_s24 = smov 0  }
   0x4   :  { %s1305_s25 = smov 0   ;;  %s1307_s26 = smov 0  }
   0x5 LB: > { %s969_s27 = sadd.s32 4294967295, %s1248_s26   ;;  %p80_p0 = scmp.ne.s32.totalorder %s1232_s22, %s1228_s21  ;;  %s1248_s26 = sphi %s1307_s26, %s20_s26   ;;  %s1244_s25 = sphi %s1305_s25, %s1518_s25   ;;  %s1240_s24 = sphi %s1303_s24, %s1517_s24   ;;  %s1236_s23 = sphi %s1301_s23, %s1516_s23   ;;  %s1232_s22 = sphi %s1299_s22, %s1515_s22   ;;  %s1228_s21 = sphi %s1297_s21, %s1514_s21  }
   0x6   : > { %p1327_p1 = scmp.eq.s32.totalorder %s969_s27, 0  ;;  %p971_p2 = scmp.ge.s32.totalorder %s1248_s26, 1 }
   0x7   : > { %p203_p3 = scmp.lt.s32.totalorder %s1248_s26, 3  ;;  %s1250_s7 = smov [#allocation6]  }
   0x8   : > { %p1335_p4 = por %p1327_p1, %p80_p0  ;;  %s221_s8 = sshll.u32 %s1250_s7, 4  ;;  %s222_s8 = int_to_ptr.vmem [resolvable:$true] %s221_s8 }
   0x9   : > { %p1339_p5 = pnand %p971_p2, %p203_p3  ;;  %s32_s10 = sadd.s32 1, %s1244_s25 }
   0xa   : > { %s1151_s11 = scalar_lea.vmem %s222_s8, 512  ;;  %p1159_p12 = scmp.lt.s32.totalorder %s222_s8, %s222_s8 }
   0xb   : > { %p1070_p6 = pneg %p1339_p5  ;;  %p1152_p9 = scmp.ne.s32.totalorder %s222_s8, %s1151_s11 }
   0xc   : > { %p1160_p13 = scmp.lt.s32.totalorder %s1151_s11, %s1151_s11 }
   0xd   : > { %p1347_p7 = pnand %p1070_p6, %p1327_p1 }
   0xe   : > { %p1161_p0 = por %p1160_p13, %p1159_p12 }
   0xf   : > { %p1142_p8 = pneg %p1347_p7 }
  0x11   : > { %p1154_p10 = pnand %p1152_p9, %p1142_p8 }
  0x13   : > { %p1155_p11 = pneg %p1154_p10 }
  0x15   : > { %p1162_p2 = pnand %p1161_p0, %p1155_p11 }
  0x17   : > { %1165 = shalt.err (!%p1162_p2)
}
  0x18   : > { %s1506_s12 = smov 128   ;;  %s1252_s13 = smov 8  }
  0x19   : > { %1073 = dma.hbm_to_vmem [thread:$0]  (!%p1347_p7), %s1503_s4, 512, %s222_s8, [#allocation7], %s1506_s12, %s1506_s12, %s1252_s13  }
  0x1a   : > { %p34_p3 = scmp.ge.s32.totalorder %s32_s10, 2  ;;  %s67_s16 = sadd.s32 1, %s1236_s23 }
  0x1b   : > { %p74_p6 = scmp.ne.s32.totalorder %s1236_s23, %s1232_s22  ;;  %p75_p8 = scmp.eq.s32.totalorder %s1248_s26, 0 }
  0x1c   : > { %s1520_s10 = smov (%p34_p3, %s32_s10), 0  ;;  %p1079_p10 = scmp.lt.s32.totalorder %s1248_s26, 2 }
  0x1d   : > { %p76_p9 = por %p75_p8, %p74_p6  ;;  %s62_s17 = ssub.s32 %s1244_s25, %s1520_s10 }
  0x1e   : > { %s245_s18 = sand.u32 1, %s1236_s23   ;;  %p65_p11 = scmp.eq.s32.totalorder %s62_s17, 0 }
  0x1f   : > { %s974_s19 = sshll.u32 %s245_s18, 5  ;;  %s1003_s20 = sshll.u32 %s1244_s25, 9 }
  0x20   : > { %s1374_s21 = scalar_select %p65_p11, %s1236_s23, %s67_s16  }
  0x21   : > { %s256_s8 = scalar_lea.hbm %s1500_s1, %s1003_s20  ;;  %s249_s9 = scalar_lea.vmem [#allocation4], %s974_s19 }
  0x22   : > { %s257_s11 = sshll.u32 %s249_s9, 4  ;;  %p1379_p7 = pnand %p1079_p10, %p76_p9  ;;  %s258_s11 = int_to_ptr.vmem [resolvable:$true] %s257_s11 }
  0x23   : > { %s246_s15 = scalar_lea.sflag [#allocation5], %s245_s18  ;;  %s1179_s17 = scalar_lea.vmem %s258_s11, 512 }
  0x24   : > { %p1168_p12 = pneg %p1379_p7  ;;  %p1180_p13 = scmp.ne.s32.totalorder %s258_s11, %s1179_s17 }
  0x25   : > { %s1253_s16 = smov [#allocation4]  }
  0x26   : > { %p1182_p0 = pnand %p1180_p13, %p1168_p12  ;;  %s1184_s12 = sshll.u32 %s1253_s16, 4  ;;  %s1185_s12 = int_to_ptr.vmem [resolvable:$false] %s1184_s12 }
  0x27   : > { %s1186_s27 = scalar_lea.vmem %s1185_s12, 1024  ;;  %p1187_p3 = scmp.lt.s32.totalorder %s258_s11, %s1185_s12 }
  0x28   : > { %p1183_p2 = pneg %p1182_p0  ;;  %p1188_p6 = scmp.lt.s32.totalorder %s1186_s27, %s1179_s17 }
  0x2a   : > { %p1189_p8 = por %p1188_p6, %p1187_p3 }
  0x2c   : > { %p1190_p9 = pnand %p1189_p8, %p1183_p2 }
  0x2e   : > { %1193 = shalt.err (!%p1190_p9)
}
  0x2f   : > { %s1512_s19 = smov 128   ;;  %269 = sbr.rel (%p1339_p5) target bundleno = 912 (0x390), region = 44 }
  0x30   : > { %1077 = dma.hbm_to_vmem [thread:$0]  (!%p1379_p7), %s256_s8, 512, %s258_s11, %s246_s15, %s1512_s19, %s1512_s19, %s1252_s13  }
  0x31   : > { %s271_s18 = sand.u32 (!%p1339_p5), 1, %s1232_s22  }
  0x32   : > { %s978_s20 = sshll.u32 (!%p1339_p5), %s271_s18, 5  ;;  %s272_s7 = scalar_lea.sflag (!%p1339_p5), [#allocation5], %s271_s18 }
  0x33   : > { %s1393_s9 = scalar_lea.vmem (!%p1339_p5), [#allocation4], %s978_s20 }
  0x34   : > { %1219 = dma.done.wait (%p1335_p4), %s272_s7, 512  }
  0x35   : > { %1221 = vsyncadd (%p1335_p4), %s272_s7, 4294966784 }
  0x36   : > { %1223 = dma.done.wait (%p1327_p1), [#allocation7], 512  }
  0x37   : > { %1225 = vsyncadd (%p1327_p1), [#allocation7], 4294966784  ;;  %v1254_v0 = vmov 0.0   ;;  %vm1255_vm0 = vmmov 0   ;;  %vm341_vm1 = vcmask 261120   ;;  %p314_p4 = scmp.lt.s32.totalorder %s1240_s24, 1 }
  0x38   : > { %1022 = vmatprep.subr.mxu0 %v1254_v0  ;;  %1030 = vmatprep.mubr.msk.f32.mxu0 %vm1255_vm0, %v1254_v0  ;;  %v333_v1 = vld [vmem:[%s1501_s2 + $0x18] sm:$0xff]  ;;  %v332_v2 = vld [vmem:[%s1501_s2 + $0x10] sm:$0xff]  ;;  %v331_v3 = vld [vmem:[%s1501_s2 + $0x8] sm:$0xff]  ;;  %vm430_vm2 = vcmask 64512   ;;  %s1256_s20 = smov 104   ;;  %s1257_s7 = smov 112  }
  0x39   : > { %1043 = vmatprep.subr.mxu1 %v1254_v0  ;;  %1045 = vmatprep.mubr.msk.f32.mxu1 %vm1255_vm0, %v1254_v0  ;;  %s1522_s24 = smov (!%p314_p4, %s1240_s24), 1  ;;  %v330_v4 = vld [vmem:[%s1501_s2] sm:$0xff]  ;;  %v428_v11 = vld [vmem:[%s1393_s9] sm:$0xff]  ;;  %s1258_s29 = smov 120   ;;  %v989_v15 = vld [vmem:[%s1393_s9 + $0x8] sm:$0xff]  ;;  %vm589_vm3 = vcmask 130112  }
  0x3a   : > { %1023 = vmatpush3.xpose.msk.msra.mxu0 %vm341_vm1, %v333_v1  ;;  %s980_s11 = sshll.u32 %s1522_s24, 3  ;;  %v982_v6 = vld [vmem:[%s1502_s3] ss:$0 sm:$0xff]  ;;  %v993_v16 = vld [vmem:[%s1393_s9 + $0x18] sm:$0xff]  ;;  %v765_v22 = vld [vmem:[#allocation6 + $0x8] sm:$0xff]  ;;  %s1260_s30 = smov 8  }
  0x3b   : > { %1024 = vmatprep.subr.mxu0 %v1254_v0  ;;  %s317_s27 = scalar_lea.vmem %s1499_s0, %s980_s11  ;;  %v991_v12 = vld [vmem:[%s1393_s9 + $0x10] sm:$0xff]  ;;  %v767_v18 = vld [vmem:[#allocation6 + $0x18] sm:$0xff]  ;;  %v764_v23 = vld [vmem:[#allocation6] sm:$0xff]  ;;  %s1259_s9 = smov 16   ;;  %vm675_vm4 = vcmask 195712   ;;  %vm761_vm5 = vcmask 261312  }
  0x3c   : > { %v329_v5 = vld [vmem:[%s317_s27] sm:$0xff]  ;;  %s1261_s28 = smov 24   ;;  %s324_s15 = scalar_lea.vmem %s1505_s6, %s980_s11 }
  0x3d   : > { %v766_v21 = vld [vmem:[#allocation6 + $0x10] sm:$0xff] }
  0x3e   : > { %1025 = vmatpush3.xpose.msk.msra.mxu0 %vm341_vm1, %v332_v2  ;;  %v995_v34 = vld [vmem:[%s1504_s5] ss:$0 sm:$0xff] }
  0x3f   : > { %1026 = vmatprep.subr.mxu0 %v1254_v0 }
  0x42   : > { %1027 = vmatpush3.xpose.msk.msra.mxu0 %vm341_vm1, %v331_v3 }
  0x43   : > { %1028 = vmatprep.subr.mxu0 %v1254_v0 }
  0x46   : > { %1029 = vmatpush3.xpose.msk.msra.mxu0 %vm341_vm1, %v330_v4 }
  0x47   : > { %1033 = vmatprep.subr.mxu0 %v1254_v0 }
  0x49   : > { %1031 = vmatmul.mubr.msk.f32.vlgmr.msra.gmra.mxu0 %vm341_vm1, %v329_v5 }
  0x4a   : > { %1035 = vmatprep.mubr.msk.f32.mxu0 %vm1255_vm0, %v1254_v0 }
 0x109   : > { %v423_v7 = vpop.f32.mrf.mxu0 }
 0x10a   : > { %v424_v8 = vadd.f32 %v982_v6, %v423_v7 }
 0x10b   : > { %v1032_v9 = vpop.f32.mrf.mxu0 }
 0x10c   : > { %427 = vst.msk [vmem:[#allocation2] sm:$0xff] %vm341_vm1, %v424_v8 }
 0x113   : > { %v679_v10 = vld [vmem:[#allocation2] sm:$0xff] }
 0x114   : > { %681 = vrot.lane.b32.xlu1 %v679_v10, %s1256_s20  ;;  %595 = vrot.lane.b32.xlu0 %v679_v10, %s1257_s7 }
 0x115   : > { %1034 = vmatpush3.msra.mxu0 %v679_v10 }
 0x116   : > { %1036 = vmatmul.mubr.msk.f32.vlgmr.msra.gmra.mxu0 %vm430_vm2, %v428_v11  ;;  %1038 = vmatprep.subr.mxu0 %v1254_v0 }
 0x117   : > { %1040 = vmatprep.mubr.msk.f32.mxu0 %vm1255_vm0, %v1254_v0 }
 0x118   : > { %509 = vrot.lane.b32.xlu0 %v679_v10, %s1258_s29 }
 0x186   : > { %v596_v13 = vpop.permute.xlu0 %595  ;;  %v682_v14 = vpop.permute.xlu1 %681 }
 0x187   : > { %1044 = vmatpush3.msra.mxu1 %v596_v13 }
 0x188   : > { %1048 = vmatprep.subr.mxu1 %v1254_v0  ;;  %1046 = vmatmul.mubr.msk.f32.vlgmr.msra.gmra.mxu1 %vm430_vm2, %v991_v12 }
 0x189   : > { %1049 = vmatpush3.msra.mxu1 %v682_v14  ;;  %1050 = vmatprep.mubr.msk.f32.mxu1 %vm1255_vm0, %v1254_v0 }
 0x18a   : > { %v510_v17 = vpop.permute.xlu0 %509  ;;  %1053 = vmatprep.subr.mxu1 %v1254_v0 }
 0x18b   : > { %1039 = vmatpush3.msra.mxu0 %v510_v17 }
 0x18c   : > { %1041 = vmatmul.mubr.msk.f32.vlgmr.msra.gmra.mxu0 %vm430_vm2, %v989_v15  ;;  %1051 = vmatmul.mubr.msk.f32.vlgmr.msra.gmra.mxu1 %vm430_vm2, %v993_v16 }
 0x18d   : > { %1061 = vmatprep.mubr.msk.f32.mxu1 %vm1255_vm0, %v1254_v0  ;;  %1054 = vmatpush3.xpose.msk.msra.mxu1 %vm341_vm1, %v767_v18 }
 0x18e   : > { %1055 = vmatprep.subr.mxu1 %v1254_v0 }
 0x191   : > { %1056 = vmatpush3.xpose.msk.msra.mxu1 %vm341_vm1, %v766_v21 }
 0x192   : > { %1057 = vmatprep.subr.mxu1 %v1254_v0 }
 0x195   : > { %1058 = vmatpush3.xpose.msk.msra.mxu1 %vm341_vm1, %v765_v22 }
 0x196   : > { %1059 = vmatprep.subr.mxu1 %v1254_v0 }
 0x199   : > { %1060 = vmatpush3.xpose.msk.msra.mxu1 %vm341_vm1, %v764_v23 }
 0x1d6   : > { %v500_v19 = vpop.f32.mrf.mxu0 }
 0x1d7   : > { %504 = vst.msk [vmem:[#allocation3] sm:$0xff] %vm430_vm2, %v500_v19 }
 0x1d8   : > { %v1037_v20 = vpop.f32.mrf.mxu0 }
 0x248   : > { %v667_v24 = vpop.f32.mrf.mxu1 }
 0x249   : > { %672 = vrot.lane.b32.xlu0 %v667_v24, %s1259_s9 }
 0x24a   : > { %v1047_v25 = vpop.f32.mrf.mxu1 }
 0x24c   : > { %v581_v26 = vpop.f32.mrf.mxu0  ;;  %v753_v27 = vpop.f32.mrf.mxu1 }
 0x24d   : > { %586 = vrot.lane.b32.xlu1 %v581_v26, %s1260_s30 }
 0x24e   : > { %v1042_v28 = vpop.f32.mrf.mxu0  ;;  %v1052_v29 = vpop.f32.mrf.mxu1 }
 0x251   : > { %758 = vrot.lane.b32.xlu1 %v753_v27, %s1261_s28 }
 0x2bb   : > { %v673_v30 = vpop.permute.xlu0 %672 }
 0x2bf   : > { %v587_v31 = vpop.permute.xlu1 %586 }
 0x2c0   : > { %590 = vst.msk [vmem:[#allocation3] sm:$0xff] %vm589_vm3, %v587_v31 }
 0x2c1   : > { %676 = vst.msk [vmem:[#allocation3] sm:$0xff] %vm675_vm4, %v673_v30 }
 0x2c3   : > { %v759_v32 = vpop.permute.xlu1 %758 }
 0x2c4   : > { %762 = vst.msk [vmem:[#allocation3] sm:$0xff] %vm761_vm5, %v759_v32 }
 0x2cb   : > { %v763_v33 = vld [vmem:[#allocation3] sm:$0xff] }
 0x2cc   : > { %1062 = vmatmul.mubr.msk.f32.vlgmr.msra.gmra.mxu1 %vm341_vm1, %v763_v33 }
 0x38c   : > { %v857_v35 = vpop.f32.mrf.mxu1 }
 0x38d   : > { %v858_v36 = vadd.f32 %v995_v34, %v857_v35 }
 0x38e   : > { %v1063_v37 = vpop.f32.mrf.mxu1 }
 0x38f   : > { %861 = vst.msk [vmem:[%s324_s15] sm:$0xff] %vm341_vm1, %v858_v36 }
 0x390 PF: > { %s20_s26 = sadd.s32 1, %s1248_s26   ;;  %s1513_s17 = smov %s1374_s21 }
 0x391   : > { %p17_p1 = scmp.ge.s32.totalorder %s20_s26, 4   ;;  %s1514_s21 = smov %s1232_s22 }
 0x392   : > { %s1515_s22 = smov %s1236_s23  ;;  %s1516_s23 = smov %s1513_s17 }
 0x393   : > { %s1517_s24 = smov %s1244_s25  ;;  %s1518_s25 = smov %s1520_s10 }
 0x394   :  { %19 = sbr.rel (!%p17_p1) target bundleno = 5 (0x5), region = 98 }
 0x399   :  { %887 = vsyncpa [#allocation5], 1 }
 0x39a   :  { %889 = vsyncpa [#allocation5 + $0x1], 1 }
 0x39b   :  { %890 = vsyncpa [#allocation7], 1 }

</bundles_post_ra>
